<compile_context>
chip_gen: v7x
topology: tpu7x:2x2x1
jax: 0.10.0
libtpu: 0.0.40
codegen_flags: <defaults>
</compile_context>

<pallas_src>
import jax
import jax.numpy as jnp
from jax.experimental import pallas as pl
from jax.experimental.pallas import tpu as pltpu


def _mlp_kernel(x_ref,
                w1_ref, b1_ref,
                w2_ref, b2_ref,
                w3_ref, b3_ref,
                w4_ref, b4_ref,
                o_ref):
    """Fused 4-layer MLP + log_softmax, feature-major (batch on lanes).

    x_ref: (state_dim, TB) bf16.  Weights are PyTorch-layout (out, in);
    w1 is bf16 (matches x), w2..w4 are f32.  Biases are (out, 1) f32 and
    broadcast over the lane (batch) axis.  All accumulation is f32.
    """
    x = x_ref[...]

    h = jnp.dot(w1_ref[...], x, preferred_element_type=jnp.float32) + b1_ref[...]
    h = jnp.maximum(h, 0.0)

    h = jnp.dot(w2_ref[...], h, preferred_element_type=jnp.float32) + b2_ref[...]
    h = jnp.maximum(h, 0.0)

    h = jnp.dot(w3_ref[...], h, preferred_element_type=jnp.float32) + b3_ref[...]
    h = jnp.maximum(h, 0.0)

    logits = jnp.dot(w4_ref[...], h,
                     preferred_element_type=jnp.float32) + b4_ref[...]   # (A, TB)

    # Numerically stable log_softmax along the action axis (sublane axis,
    # only num_actions rows -> cheap VPU/XLU work).
    m = jnp.max(logits, axis=0, keepdims=True)
    z = logits - m
    lse = jnp.log(jnp.sum(jnp.exp(z), axis=0, keepdims=True))
    o_ref[...] = (z - lse).astype(o_ref.dtype)


def _round_up(x, m):
    return ((x + m - 1) // m) * m


def model_forward(x, params, tile_b=None):
    """Fused policy MLP.  x: (B, state_dim) f32 -> (B, num_actions) f32 log-probs."""
    (w1, b1), (w2, b2), (w3, b3), (w4, b4) = params   # PyTorch layout: (out, in), (out,)
    B, state_dim = x.shape
    num_actions = w4.shape[0]

    # Feature-major input: one fused XLA pass (transpose + cast [+ pad]) over x.
    x_t = x.T.astype(jnp.bfloat16)                    # (state_dim, B)
    w1b = w1.astype(jnp.bfloat16)                     # only layer-1 operands are bf16
    w2f, w3f, w4f = w2, w3, w4                        # f32 (MXU nowhere near bound)
    b1c, b2c, b3c, b4c = (b.reshape(-1, 1) for b in (b1, b2, b3, b4))

    # --- batch-tile selection -------------------------------------------------
    if tile_b is None:
        if B <= 1024:
            tile_b = B                                # single tile
        else:
            # >=2 grid steps so v7x's two TensorCores both get work; 8192-row
            # tiles amortize the ~0.35us/step overhead.  Per-tile VMEM in this
            # layout is ~0.4 KiB/row -> a few MiB, safe on v5e/v6e/v7x default
            # scoped limits (no vmem_limit_bytes override needed).
            tile_b = min(8192, _round_up(pl.cdiv(B, 2), 128))

    tile_b = min(tile_b, B)
    if tile_b < B:
        tile_b = _round_up(tile_b, 128)               # batch rides the lane axis
        if tile_b >= B:
            tile_b = B
    b_padded = _round_up(B, tile_b) if tile_b < B else B
    if b_padded != B:
        # Fuses with the transpose/cast above -> no extra HBM round-trip.
        x_t = jnp.pad(x_t, ((0, 0), (0, b_padded - B)))

    grid = (b_padded // tile_b,)

    def batch_map(i):            # x / out: walk the batch (lane) axis
        return (0, i)

    def resident_map(i):         # weights/biases: same block every step -> stay in VMEM
        return (0, 0)

    out_t = pl.pallas_call(
        _mlp_kernel,
        out_shape=jax.ShapeDtypeStruct((num_actions, b_padded), jnp.float32),
        grid=grid,
        in_specs=[
            pl.BlockSpec((state_dim, tile_b), batch_map),
            pl.BlockSpec(w1b.shape, resident_map), pl.BlockSpec(b1c.shape, resident_map),
            pl.BlockSpec(w2f.shape, resident_map), pl.BlockSpec(b2c.shape, resident_map),
            pl.BlockSpec(w3f.shape, resident_map), pl.BlockSpec(b3c.shape, resident_map),
            pl.BlockSpec(w4f.shape, resident_map), pl.BlockSpec(b4c.shape, resident_map),
        ],
        out_specs=pl.BlockSpec((num_actions, tile_b), batch_map),
        compiler_params=pltpu.CompilerParams(
            dimension_semantics=("parallel",)),
    )(x_t, w1b, b1c, w2f, b2c, w3f, b3c, w4f, b4c)

    if b_padded != B:
        out_t = out_t[:, :B]
    return out_t.T                                    # (B, num_actions)


def init_params(key, state_dim, num_actions):
    """kaiming_normal (fan_in, gain=sqrt(2)) weights in PyTorch (out, in) layout,
    zero biases — matching the reference module's init."""
    dims = [(16, state_dim), (16, 16), (16, 16), (num_actions, 16)]
    params = []
    for (fan_out, fan_in) in dims:
        key, sub = jax.random.split(key)
        std = (2.0 / fan_in) ** 0.5
        w = std * jax.random.normal(sub, (fan_out, fan_in), dtype=jnp.float32)
        b = jnp.zeros((fan_out,), dtype=jnp.float32)
        params.append((w, b))
    return params


def reference_forward_f32(x, params):
    """Pure-f32 pure-JAX reference (semantics of the PyTorch module)."""
    (w1, b1), (w2, b2), (w3, b3), (w4, b4) = params
    h = jnp.maximum(x @ w1.T + b1, 0.0)
    h = jnp.maximum(h @ w2.T + b2, 0.0)
    h = jnp.maximum(h @ w3.T + b3, 0.0)
    return jax.nn.log_softmax(h @ w4.T + b4, axis=-1)


def reference_forward_matched(x, params):
    """Reference with the kernel's dtype flow: layer-1 operands bf16 (f32 acc),
    layers 2-4 fully f32.  Tight numerical comparison target."""
    (w1, b1), (w2, b2), (w3, b3), (w4, b4) = params
    h = jnp.dot(x.astype(jnp.bfloat16), w1.T.astype(jnp.bfloat16),
                preferred_element_type=jnp.float32) + b1
    h = jnp.maximum(h, 0.0)
    h = jnp.maximum(h @ w2.T + b2, 0.0)
    h = jnp.maximum(h @ w3.T + b3, 0.0)
    return jax.nn.log_softmax(h @ w4.T + b4, axis=-1)


if __name__ == "__main__":
    key = jax.random.PRNGKey(0)
    batch, state_dim, num_actions = 64, 32, 4

    key, kx = jax.random.split(key)
    x = jax.random.normal(kx, (batch, state_dim), dtype=jnp.float32)
    params = init_params(key, state_dim, num_actions)

    ref_m = reference_forward_matched(x, params)
    ref_f = reference_forward_f32(x, params)

    # 1) Single-tile path (whole batch in one grid step).
    out = jax.block_until_ready(model_forward(x, params))
    assert out.shape == (batch, num_actions)
    assert jnp.allclose(out, ref_m, atol=2e-3, rtol=2e-3), \
        "mismatch vs dtype-matched reference"
    # Coarse check vs the full-f32 module (layer-1 bf16 operands are the only
    # intended deviation).
    assert jnp.allclose(out, ref_f, atol=0.1), "mismatch vs f32 reference"

    # 2) Multi-tile pipelined path with ragged batch (tile_b=128, B=200 -> pad
    #    to 256, 2 grid steps) exercising padding + lane-tiled batch axis.
    b2 = 200
    key, kx2 = jax.random.split(key)
    x2 = jax.random.normal(kx2, (b2, state_dim), dtype=jnp.float32)
    out2 = jax.block_until_ready(model_forward(x2, params, tile_b=128))
    assert out2.shape == (b2, num_actions)
    assert jnp.allclose(out2, reference_forward_matched(x2, params),
                        atol=2e-3, rtol=2e-3), "tiled path mismatch"
    assert jnp.allclose(out2, reference_forward_f32(x2, params), atol=0.1), \
        "tiled path mismatch vs f32 reference"

    print("KERNEL_OK")
</pallas_src>

<mosaic_0001>
module attributes {stable_mosaic.version = 11 : i64} {
  func.func @_mlp_kernel(%arg0: i32, %arg1: memref<32x64xbf16, #tpu.memory_space<vmem>>, %arg2: memref<16x32xbf16, #tpu.memory_space<vmem>>, %arg3: memref<16x1xf32, #tpu.memory_space<vmem>>, %arg4: memref<16x16xf32, #tpu.memory_space<vmem>>, %arg5: memref<16x1xf32, #tpu.memory_space<vmem>>, %arg6: memref<16x16xf32, #tpu.memory_space<vmem>>, %arg7: memref<16x1xf32, #tpu.memory_space<vmem>>, %arg8: memref<4x16xf32, #tpu.memory_space<vmem>>, %arg9: memref<4x1xf32, #tpu.memory_space<vmem>>, %arg10: memref<4x64xf32, #tpu.memory_space<vmem>>) attributes {dimension_semantics = [#tpu.dimension_semantics<parallel>], iteration_bounds = array<i64: 1>, scalar_prefetch = 0 : i64, scratch_operands = 0 : i64, tpu.core_type = #tpu.core_type<tc>, window_params = [{transform_indices = @transform_0, window_bounds = array<i64: 32, 64>}, {pipeline_mode = #tpu.pipeline_mode<synchronous>, transform_indices = @transform_1, window_bounds = array<i64: 16, 32>}, {pipeline_mode = #tpu.pipeline_mode<synchronous>, transform_indices = @transform_2, window_bounds = array<i64: 16, 1>}, {pipeline_mode = #tpu.pipeline_mode<synchronous>, transform_indices = @transform_3, window_bounds = array<i64: 16, 16>}, {pipeline_mode = #tpu.pipeline_mode<synchronous>, transform_indices = @transform_4, window_bounds = array<i64: 16, 1>}, {pipeline_mode = #tpu.pipeline_mode<synchronous>, transform_indices = @transform_5, window_bounds = array<i64: 16, 16>}, {pipeline_mode = #tpu.pipeline_mode<synchronous>, transform_indices = @transform_6, window_bounds = array<i64: 16, 1>}, {pipeline_mode = #tpu.pipeline_mode<synchronous>, transform_indices = @transform_7, window_bounds = array<i64: 4, 16>}, {pipeline_mode = #tpu.pipeline_mode<synchronous>, transform_indices = @transform_8, window_bounds = array<i64: 4, 1>}, {transform_indices = @transform_9, window_bounds = array<i64: 4, 64>}]} {
    %c0 = arith.constant 0 : index
    %c0_0 = arith.constant 0 : index
    %0 = vector.load %arg1[%c0, %c0_0] : memref<32x64xbf16, #tpu.memory_space<vmem>>, vector<32x64xbf16>
    %c0_1 = arith.constant 0 : index
    %c0_2 = arith.constant 0 : index
    %1 = vector.load %arg2[%c0_1, %c0_2] : memref<16x32xbf16, #tpu.memory_space<vmem>>, vector<16x32xbf16>
    %cst = arith.constant dense<0.000000e+00> : vector<16x64xf32>
    %2 = tpu.matmul %1, %0, %cst {dimension_numbers = #tpu.dot_dimension_numbers<[1], [0], [0], [1], [0, 0, 1, 1], [], []>} : vector<16x32xbf16>, vector<32x64xbf16>, vector<16x64xf32> -> vector<16x64xf32>
    %c0_3 = arith.constant 0 : index
    %c0_4 = arith.constant 0 : index
    %3 = vector.load %arg3[%c0_3, %c0_4] : memref<16x1xf32, #tpu.memory_space<vmem>>, vector<16x1xf32>
    %4 = vector.broadcast %3 : vector<16x1xf32> to vector<16x64xf32>
    %5 = arith.addf %2, %4 : vector<16x64xf32>
    %cst_5 = arith.constant 0.000000e+00 : f32
    %6 = vector.broadcast %cst_5 : f32 to vector<16x64xf32>
    %7 = arith.maximumf %5, %6 : vector<16x64xf32>
    %c0_6 = arith.constant 0 : index
    %c0_7 = arith.constant 0 : index
    %8 = vector.load %arg4[%c0_6, %c0_7] : memref<16x16xf32, #tpu.memory_space<vmem>>, vector<16x16xf32>
    %cst_8 = arith.constant dense<0.000000e+00> : vector<16x64xf32>
    %9 = tpu.matmul %8, %7, %cst_8 {dimension_numbers = #tpu.dot_dimension_numbers<[1], [0], [0], [1], [0, 0, 1, 1], [], []>} : vector<16x16xf32>, vector<16x64xf32>, vector<16x64xf32> -> vector<16x64xf32>
    %c0_9 = arith.constant 0 : index
    %c0_10 = arith.constant 0 : index
    %10 = vector.load %arg5[%c0_9, %c0_10] : memref<16x1xf32, #tpu.memory_space<vmem>>, vector<16x1xf32>
    %11 = vector.broadcast %10 : vector<16x1xf32> to vector<16x64xf32>
    %12 = arith.addf %9, %11 : vector<16x64xf32>
    %cst_11 = arith.constant 0.000000e+00 : f32
    %13 = vector.broadcast %cst_11 : f32 to vector<16x64xf32>
    %14 = arith.maximumf %12, %13 : vector<16x64xf32>
    %c0_12 = arith.constant 0 : index
    %c0_13 = arith.constant 0 : index
    %15 = vector.load %arg6[%c0_12, %c0_13] : memref<16x16xf32, #tpu.memory_space<vmem>>, vector<16x16xf32>
    %cst_14 = arith.constant dense<0.000000e+00> : vector<16x64xf32>
    %16 = tpu.matmul %15, %14, %cst_14 {dimension_numbers = #tpu.dot_dimension_numbers<[1], [0], [0], [1], [0, 0, 1, 1], [], []>} : vector<16x16xf32>, vector<16x64xf32>, vector<16x64xf32> -> vector<16x64xf32>
    %c0_15 = arith.constant 0 : index
    %c0_16 = arith.constant 0 : index
    %17 = vector.load %arg7[%c0_15, %c0_16] : memref<16x1xf32, #tpu.memory_space<vmem>>, vector<16x1xf32>
    %18 = vector.broadcast %17 : vector<16x1xf32> to vector<16x64xf32>
    %19 = arith.addf %16, %18 : vector<16x64xf32>
    %cst_17 = arith.constant 0.000000e+00 : f32
    %20 = vector.broadcast %cst_17 : f32 to vector<16x64xf32>
    %21 = arith.maximumf %19, %20 : vector<16x64xf32>
    %c0_18 = arith.constant 0 : index
    %c0_19 = arith.constant 0 : index
    %22 = vector.load %arg8[%c0_18, %c0_19] : memref<4x16xf32, #tpu.memory_space<vmem>>, vector<4x16xf32>
    %cst_20 = arith.constant dense<0.000000e+00> : vector<4x64xf32>
    %23 = tpu.matmul %22, %21, %cst_20 {dimension_numbers = #tpu.dot_dimension_numbers<[1], [0], [0], [1], [0, 0, 1, 1], [], []>} : vector<4x16xf32>, vector<16x64xf32>, vector<4x64xf32> -> vector<4x64xf32>
    %c0_21 = arith.constant 0 : index
    %c0_22 = arith.constant 0 : index
    %24 = vector.load %arg9[%c0_21, %c0_22] : memref<4x1xf32, #tpu.memory_space<vmem>>, vector<4x1xf32>
    %25 = vector.broadcast %24 : vector<4x1xf32> to vector<4x64xf32>
    %26 = arith.addf %23, %25 : vector<4x64xf32>
    %cst_23 = arith.constant dense<0xFF800000> : vector<64xf32>
    %27 = vector.multi_reduction <maximumf>, %26, %cst_23 [0] : vector<4x64xf32> to vector<64xf32>
    %28 = vector.shape_cast %27 : vector<64xf32> to vector<1x64xf32>
    %29 = vector.broadcast %28 : vector<1x64xf32> to vector<4x64xf32>
    %30 = arith.subf %26, %29 : vector<4x64xf32>
    %31 = math.exp %30 : vector<4x64xf32>
    %cst_24 = arith.constant dense<0.000000e+00> : vector<64xf32>
    %32 = vector.multi_reduction <add>, %31, %cst_24 [0] : vector<4x64xf32> to vector<64xf32>
    %33 = vector.shape_cast %32 : vector<64xf32> to vector<1x64xf32>
    %34 = math.log %33 : vector<1x64xf32>
    %35 = vector.broadcast %34 : vector<1x64xf32> to vector<4x64xf32>
    %36 = arith.subf %30, %35 : vector<4x64xf32>
    %c0_25 = arith.constant 0 : index
    %c0_26 = arith.constant 0 : index
    %37 = vector.load %arg10[%c0_25, %c0_26] : memref<4x64xf32, #tpu.memory_space<vmem>>, vector<4x64xf32>
    tpu.vector_store %arg10[%c0_25, %c0_26], %36 {strides = array<i32>} : memref<4x64xf32, #tpu.memory_space<vmem>>, vector<4x64xf32>,
    return
  }
  func.func @transform_0(%arg0: i32) -> (i32, i32) {
    %c0_i32 = arith.constant 0 : i32
    %c0_i32_0 = arith.constant 0 : i32
    return %c0_i32, %arg0 : i32, i32
  }
  func.func @transform_1(%arg0: i32) -> (i32, i32) {
    %c0_i32 = arith.constant 0 : i32
    %c0_i32_0 = arith.constant 0 : i32
    %c0_i32_1 = arith.constant 0 : i32
    return %c0_i32, %c0_i32_0 : i32, i32
  }
  func.func @transform_2(%arg0: i32) -> (i32, i32) {
    %c0_i32 = arith.constant 0 : i32
    %c0_i32_0 = arith.constant 0 : i32
    %c0_i32_1 = arith.constant 0 : i32
    return %c0_i32, %c0_i32_0 : i32, i32
  }
  func.func @transform_3(%arg0: i32) -> (i32, i32) {
    %c0_i32 = arith.constant 0 : i32
    %c0_i32_0 = arith.constant 0 : i32
    %c0_i32_1 = arith.constant 0 : i32
    return %c0_i32, %c0_i32_0 : i32, i32
  }
  func.func @transform_4(%arg0: i32) -> (i32, i32) {
    %c0_i32 = arith.constant 0 : i32
    %c0_i32_0 = arith.constant 0 : i32
    %c0_i32_1 = arith.constant 0 : i32
    return %c0_i32, %c0_i32_0 : i32, i32
  }
  func.func @transform_5(%arg0: i32) -> (i32, i32) {
    %c0_i32 = arith.constant 0 : i32
    %c0_i32_0 = arith.constant 0 : i32
    %c0_i32_1 = arith.constant 0 : i32
    return %c0_i32, %c0_i32_0 : i32, i32
  }
  func.func @transform_6(%arg0: i32) -> (i32, i32) {
    %c0_i32 = arith.constant 0 : i32
    %c0_i32_0 = arith.constant 0 : i32
    %c0_i32_1 = arith.constant 0 : i32
    return %c0_i32, %c0_i32_0 : i32, i32
  }
  func.func @transform_7(%arg0: i32) -> (i32, i32) {
    %c0_i32 = arith.constant 0 : i32
    %c0_i32_0 = arith.constant 0 : i32
    %c0_i32_1 = arith.constant 0 : i32
    return %c0_i32, %c0_i32_0 : i32, i32
  }
  func.func @transform_8(%arg0: i32) -> (i32, i32) {
    %c0_i32 = arith.constant 0 : i32
    %c0_i32_0 = arith.constant 0 : i32
    %c0_i32_1 = arith.constant 0 : i32
    return %c0_i32, %c0_i32_0 : i32, i32
  }
  func.func @transform_9(%arg0: i32) -> (i32, i32) {
    %c0_i32 = arith.constant 0 : i32
    %c0_i32_0 = arith.constant 0 : i32
    return %c0_i32, %arg0 : i32, i32
  }
}

</mosaic_0001>

<bundles_post_ra>
// kernel: tpu_custom_call.1
= control target key start
LH: loop header
LB: loop body
LE: loop exit
PB: predicated region body
PF: predicated region fallthrough
CT: control target
= control target key end

     0   :  { %v528_v1 = vmov 0.0   ;;  %vm529_vm0 = vmmov 0   ;;  %v530_v4 = vmov 0   ;;  %s650_s0 = inlined_call_operand.vmem [shape: bf16[32,64], index: 0, kind: input, shape index: {}]   ;;  %s651_s1 = inlined_call_operand.vmem [shape: bf16[16,32], index: 1, kind: input, shape index: {}]   ;;  %s652_s2 = inlined_call_operand.vmem [shape: f32[16,1], index: 2, kind: input, shape index: {}]   ;;  %s653_s3 = inlined_call_operand.vmem [shape: f32[16,16], index: 3, kind: input, shape index: {}]   ;;  %s654_s4 = inlined_call_operand.vmem [shape: f32[16,1], index: 4, kind: input, shape index: {}]   ;;  %s655_s5 = inlined_call_operand.vmem [shape: f32[16,16], index: 5, kind: input, shape index: {}]   ;;  %s656_s6 = inlined_call_operand.vmem [shape: f32[16,1], index: 6, kind: input, shape index: {}]   ;;  %s657_s7 = inlined_call_operand.vmem [shape: f32[4,16], index: 7, kind: input, shape index: {}]   ;;  %s658_s8 = inlined_call_operand.vmem [shape: f32[4,1], index: 8, kind: input, shape index: {}]   ;;  %s659_s9 = inlined_call_operand.hbm [shape: f32[4,64], index: 9, kind: output, shape index: {}]  }
   0x1   :  { %v497_v0 = vld [vmem:[%s650_s0] sm:$0xff]   ;;  %450 = vmatprep.subr.bf16.mxu0 %v528_v1  ;;  %v498_v2 = vld [vmem:[%s650_s0 + $0x8] sm:$0xff]   ;;  %454 = vmatprep.mubr.msk.bf16.mxu0 %vm529_vm0, %v528_v1 }
   0x2   :  { %451 = vmatpush3.bf16.msra.mxu0 %v497_v0  ;;  %v40_v3 = vld [vmem:[%s652_s2] sm:$0xff]  ;;  %495 = vset.pattern.permute.xlu0 %v530_v4 }
   0x3   :  { %452 = vmatprep.subr.bf16.mxu0 %v528_v1  ;;  %496 = vset.pattern.permute.xlu1 %v530_v4 }
   0x4   :  { %14 = vsyncpa [#allocation3], 0  ;;  %v499_v5 = vld [vmem:[%s651_s1] sm:$0xff]   ;;  %44 = vperm.xlu0 %495, %v40_v3   ;;  %vm69_vm1 = vcmask 261120   ;;  %v41_v6 = vld [vmem:[%s652_s2 + $0x8] sm:$0xff]  ;;  %vm130_vm2 = vcmask 130048  }
   0x5   :  { %v216_v7 = vld [vmem:[%s656_s6] sm:$0xff]  ;;  %v119_v11 = vld [vmem:[%s654_s4 + $0x8] sm:$0xff]  ;;  %v531_v36 = vmov 0.0|0.0   ;;  %vm391_vm3 = vcmask 519168  }
   0x6   :  { %453 = vmatpush3.bf16.msra.mxu0 %v498_v2  ;;  %v312_v8 = vld [vmem:[%s658_s8] sm:$0xf]  ;;  %v217_v12 = vld [vmem:[%s656_s6 + $0x8] sm:$0xff] }
   0x7   :  { %v116_v9 = vld [vmem:[%s653_s3] sm:$0xff]  ;;  %v117_v24 = vld [vmem:[%s653_s3 + $0x8] sm:$0xff] }
   0x8   :  { %49 = vperm.xlu0 %495, %v41_v6   ;;  %462 = vmatprep.mubr.msk.f32.mxu1 %vm130_vm2, %v116_v9  ;;  %v118_v10 = vld [vmem:[%s654_s4] sm:$0xff]  ;;  %v215_v35 = vld [vmem:[%s655_s5 + $0x8] sm:$0xff] }
   0x9   :  { %455 = vmatmul.mubr.msk.bf16.vlgmr.msra.gmra.mrb[0].mxu0 %vm69_vm1, %v499_v5  ;;  %122 = vperm.xlu1 %496, %v118_v10   ;;  %v214_v25 = vld [vmem:[%s655_s5] sm:$0xff]  ;;  %s532_s5 = smov [#allocation2]  }
   0xa   :  { %v311_v46 = vld [vmem:[%s657_s7] sm:$0xf]  ;;  %s419_s7 = sshll.u32 %s532_s5, 4  ;;  %s420_s7 = int_to_ptr.vmem [resolvable:$true] %s419_s7 }
   0xb   :  { %s504_s11 = scalar_lea.vmem %s420_s7, 64  ;;  %p509_p1 = scmp.lt.s32.totalorder %s420_s7, %s420_s7 }
   0xc   :  { %220 = vperm.xlu0 %495, %v216_v7   ;;  %p505_p0 = scmp.ne.s32.totalorder %s420_s7, %s504_s11  ;;  %p510_p2 = scmp.lt.s32.totalorder %s504_s11, %s504_s11 }
   0xd   :  { %127 = vperm.xlu1 %496, %v119_v11  }
   0xe   :  { %p511_p3 = por %p510_p2, %p509_p1 }
  0x10   :  { %315 = vperm.xlu0 %495, %v312_v8   ;;  %p512_p4 = pnand %p511_p3, %p505_p0 }
  0x11   :  { %225 = vperm.xlu1 %496, %v217_v12  }
  0x83   :  { %v45_v13 = vpop.permute.xlu0 %44 }
  0x87   :  { %v50_v17 = vpop.permute.xlu0 %49 }
  0x88   :  { %v123_v26 = vpop.permute.xlu1 %122 }
  0x8b   :  { %v221_v39 = vpop.permute.xlu0 %220 }
  0x8c   :  { %v128_v27 = vpop.permute.xlu1 %127 }
  0x8f   :  { %v316_v47 = vpop.permute.xlu0 %315 }
  0x90   :  { %v226_v37 = vpop.permute.xlu1 %225 }
  0xdc   :  { %v107_v14 = vpop.f32.mrb[0].mxu0 }
  0xdd   :  { %v108_v15 = vadd.f32 %v107_v14, %v45_v13  ;;  %v456_v16 = vpop.f32.mrb[1].mxu0 }
  0xde   :  { %v110_v18 = vpop.f32.mrb[2].mxu0 }
  0xdf   :  { %v111_v19 = vadd.f32 %v110_v18, %v50_v17  ;;  %v457_v20 = vpop.f32.mrb[3].mxu0  ;;  %v114_v21 = vmax.f32 %v108_v15, 0.0 }
  0xe1   :  { %v115_v22 = vmax.f32 %v111_v19, 0.0 }
  0xe3   :  { %v479_v23 = vpack.c.bf16 %v115_v22, %v114_v21 }
  0xe5   :  { %480 = vmatprep.subr.bf16.mxu1 %v479_v23 }
  0xe6   :  { %482 = vmatpush3.bf16.msra.mxu1 %v479_v23 }
  0xe9   :  { %463 = vmatmul.mubr.msk.f32.vlgmr.msra.gmra.mrb[0].mxu1 %vm130_vm2, %v117_v24 }
  0xea   :  { %469 = vmatprep.mubr.msk.f32.mxu1 %vm130_vm2, %v214_v25 }
 0x1bc   :  { %v464_v28 = vpop.f32.mrb[0].mxu1 }
 0x1bd   :  { %v209_v29 = vadd.f32 %v464_v28, %v128_v27  ;;  %v203_v30 = vpop.f32.mrb[1].mxu1 }
 0x1be   :  { %v204_v31 = vadd.f32 %v203_v30, %v123_v26 }
 0x1bf   :  { %v213_v32 = vmax.f32 %v209_v29, 0.0 }
 0x1c0   :  { %v212_v33 = vmax.f32 %v204_v31, 0.0 }
 0x1c2   :  { %v483_v34 = vpack.c.bf16 %v213_v32, %v212_v33 }
 0x1c4   :  { %484 = vmatprep.subr.bf16.mxu1 %v483_v34 }
 0x1c5   :  { %486 = vmatpush3.bf16.msra.mxu1 %v483_v34 }
 0x1c6   :  { %487 = vmatprep.subr.bf16.mxu1 %v531_v36 }
 0x1c8   :  { %470 = vmatmul.mubr.msk.f32.vlgmr.msra.gmra.mrb[2].mxu1 %vm130_vm2, %v215_v35 }
 0x1c9   :  { %476 = vmatprep.mubr.msk.f32.mxu1 %vm529_vm0, %v528_v1 }
 0x29b   :  { %v471_v38 = vpop.f32.mrb[2].mxu1 }
 0x29c   :  { %v306_v40 = vadd.f32 %v471_v38, %v226_v37  ;;  %v300_v41 = vpop.f32.mrb[3].mxu1 }
 0x29d   :  { %v301_v42 = vadd.f32 %v300_v41, %v221_v39 }
 0x29e   :  { %v310_v43 = vmax.f32 %v306_v40, 0.0 }
 0x29f   :  { %v309_v44 = vmax.f32 %v301_v42, 0.0 }
 0x2a1   :  { %v488_v45 = vpack.c.bf16 %v310_v43, %v309_v44 }
 0x2a3   :  { %489 = vmatpush3.bf16.msra.mxu1 %v488_v45 }
 0x2a6   :  { %477 = vmatmul.mubr.msk.f32.vlgmr.msra.gmra.mrb[4].mxu1 %vm130_vm2, %v311_v46 }
 0x379   :  { %v387_v48 = vpop.f32.mrb[4].mxu1 }
 0x37a   :  { %v388_v49 = vadd.f32 %v387_v48, %v316_v47  ;;  %v478_v50 = vpop.f32.mrb[5].mxu1 }
 0x37c   :  { %v392_v51 = vsel %vm391_vm3, %v388_v49, -inf }
 0x37d   :  { %v393_v52 = vrot.slane %v392_v51, 4 }
 0x37f   :  { %v394_v53 = vmax.f32 %v392_v51, %v393_v52 }
 0x381   :  { %v395_v54 = vrot.slane %v394_v53, 2 }
 0x383   :  { %v396_v55 = vmax.f32 %v394_v53, %v395_v54 }
 0x385   :  { %v397_v56 = vrot.slane %v396_v55, 1 }
 0x387   :  { %v398_v57 = vmax.f32 %v396_v55, %v397_v56 }
 0x389   :  { %v399_v58 = vsub.f32 %v388_v49, %v398_v57 }
 0x38b   :  { %v400_v59 = vmul.f32 1.442695, %v399_v58 }
 0x38d   :  { %500 = vpow2.f32 %v400_v59 }
 0x397   :  { %v501_v60 = vpop.eup %500 }
 0x398   :  { %v402_v61 = vsel %vm391_vm3, %v501_v60, 0.0 }
 0x399   :  { %v403_v62 = vrot.slane %v402_v61, 4 }
 0x39b   :  { %v404_v63 = vadd.f32 %v403_v62, %v402_v61 }
 0x39d   :  { %v405_v0 = vrot.slane %v404_v63, 2 }
 0x39f   :  { %v406_v1 = vadd.f32 %v405_v0, %v404_v63 }
 0x3a1   :  { %v407_v2 = vrot.slane %v406_v1, 1 }
 0x3a3   :  { %v408_v3 = vadd.f32 %v407_v2, %v406_v1 }
 0x3a5   :  { %502 = vlog2.f32 %v408_v3 }
 0x3af   :  { %v503_v4 = vpop.eup %502 }
 0x3b0   :  { %v410_v5 = vmul.f32 0.6931472, %v503_v4 }
 0x3b2   :  { %v411_v6 = vsub.f32 %v399_v58, %v410_v5 }
 0x3b4   :  { %412 = vst.msk [vmem:[#allocation2] sm:$0xf] %vm391_vm3, %v411_v6 }
 0x3b5   :  { %515 = shalt.err (!%p512_p4)
}
 0x3b6   :  { %s516_s14 = scalar_lea.hbm %s659_s9, 64 }
 0x3b7   :  { %p517_p5 = scmp.ne.s32.totalorder %s659_s9, %s516_s14  ;;  %p520_p6 = scmp.lt.u32.totalorder %s516_s14, %s659_s9 }
 0x3b9   :  { %p522_p7 = pnand %p520_p6, %p517_p5 }
 0x3bb   :  { %525 = shalt.err (!%p522_p7)
}
 0x3bc   :  { %422 = dma.vmem_to_hbm [thread:$0]  %s420_s7, 64, %s659_s9, [#allocation3]  }
 0x3bd   :  { %526 = dma.done.wait [#allocation3], 64  }
 0x3be   :  { %527 = vsyncadd [#allocation3], 4294967232 }
 0x3bf   :  { %426 = vsyncpa [#allocation3], 1 }

</bundles_post_ra>
